<compile_context>
chip_gen: v6e
topology: v6e:2x2x1
jax: 0.10.0
libtpu: 0.0.40
codegen_flags: <defaults>
</compile_context>

<pallas_src>
import jax
import jax.numpy as jnp
from jax.experimental import pallas as pl
from jax.experimental.pallas import tpu as pltpu

MiB = 1024 * 1024


def _round_up(x, m):
    return (x + m - 1) // m * m


def _round_down(x, m):
    return x // m * m


def _vmem_budget_bytes():
    """Scoped-VMEM limit (75% of physical) and total x double-buffer budget."""
    try:
        cap = int(pltpu.get_tpu_info().vmem_capacity_bytes)  # 128 MiB v5e/v6e, 64 MiB v7x
    except Exception:
        cap = 64 * MiB  # conservative: smallest generation (v7x per-TC VMEM)
    vmem_limit = int(cap * 3 // 4)                # leave headroom for Mosaic scratch
    x_db_budget = min(vmem_limit // 2, 48 * MiB)  # bytes for the 2x-buffered x tile
    return vmem_limit, x_db_budget


def _linear_rows_kernel(x_ref, w_ref, b_ref, o_ref):
    """Row-major path (D >= 128).

    x_ref: (TM, D) VMEM (streamed)   w_ref: (1, D) VMEM (resident weight row)
    b_ref: (1, 1) SMEM scalar        o_ref: (TM, 1) VMEM
    """
    tm, d = x_ref.shape
    prod = x_ref[...] * w_ref[...]                     # VPU broadcast-multiply (fused)
    if d % 128 == 0 and d > 128:
        # Two-stage reduce: VALU-add the D/128 lane chunks into a (TM, 128)
        # partial, then a single cross-lane (XLU) reduce per row strip.
        partial = prod.reshape(tm, d // 128, 128).sum(axis=1)
        acc = partial.sum(axis=-1, keepdims=True)
    else:
        acc = jnp.sum(prod, axis=-1, keepdims=True)    # direct lane reduction
    o_ref[...] = (acc + b_ref[0, 0]).astype(o_ref.dtype)


def _linear_lanes_kernel(xt_ref, w_ref, b_ref, o_ref):
    """Lane-dense small-D path (D < 128): batch on lanes.

    xt_ref: (D, TN) VMEM (streamed x^T)  w_ref: (D, 1) VMEM (resident weight col)
    b_ref:  (1, 1) SMEM scalar           o_ref: (1, TN) VMEM (lane-dense row)
    """
    prod = xt_ref[...] * w_ref[...]                    # VPU broadcast along lanes
    acc = jnp.sum(prod, axis=0, keepdims=True)         # sublane reduce -> (1, TN)
    o_ref[...] = (acc + b_ref[0, 0]).astype(o_ref.dtype)


def linear_regression_forward(x, weight, bias, *, small_d_threshold=128):
    """Forward of nn.Linear(input_dim, 1): y = x @ W^T + b.

    x: (B, D) f32, weight: (1, D) f32 (PyTorch layout), bias: (1,) f32.
    Returns y: (B, 1) f32.
    """
    B, D = x.shape
    x = x.astype(jnp.float32)
    b_smem = bias.reshape(1, 1).astype(jnp.float32)

    vmem_limit, x_db_budget = _vmem_budget_bytes()
    per_buf = x_db_budget // 2  # byte target for each single x tile buffer

    cparams = pltpu.CompilerParams(
        dimension_semantics=("parallel",),
        vmem_limit_bytes=vmem_limit,
    )

    if D < small_d_threshold:
        # ---- Small-D path: batch on lanes (lane-dense compute and stores). ----
        # The x^T relayout is one extra HBM pass; for D < 128 it is far cheaper
        # than the 128/D wasted lanes + masked 1-lane stores it removes.
        xt = x.T                                            # (D, B)
        w_col = weight.reshape(D, 1).astype(jnp.float32)

        tn_budget = max(128, _round_down(per_buf // (D * 4), 128))
        tn = B if tn_budget >= B else tn_budget             # full dim, or multiple of 128
        grid = pl.cdiv(B, tn)                               # ragged tail clipped by Pallas

        out_row = pl.pallas_call(
            _linear_lanes_kernel,
            out_shape=jax.ShapeDtypeStruct((1, B), jnp.float32),
            grid=(grid,),
            in_specs=[
                pl.BlockSpec((D, tn), lambda i: (0, i)),             # streamed x^T tile
                pl.BlockSpec((D, 1), lambda i: (0, 0)),              # resident weight col
                pl.BlockSpec(memory_space=pltpu.MemorySpace.SMEM),   # scalar bias
            ],
            out_specs=pl.BlockSpec((1, tn), lambda i: (0, i)),       # lane-dense output
            compiler_params=cparams,
        )(xt, w_col, b_smem)
        return out_row.reshape(B, 1)

    # ---- Row-major path (D >= 128): stream (TM, D) tiles of x as-is. ----
    w_row = weight.reshape(1, D).astype(jnp.float32)

    bytes_per_row = D * 4
    tm = min(_round_up(B, 8), max(8, _round_down(per_buf // bytes_per_row, 8)))
    grid = pl.cdiv(B, tm)                                   # no host-side padding of x

    out = pl.pallas_call(
        _linear_rows_kernel,
        out_shape=jax.ShapeDtypeStruct((B, 1), jnp.float32),
        grid=(grid,),
        in_specs=[
            pl.BlockSpec((tm, D), lambda i: (i, 0)),                 # streamed x tile
            pl.BlockSpec((1, D), lambda i: (0, 0)),                  # resident weight row
            pl.BlockSpec(memory_space=pltpu.MemorySpace.SMEM),       # scalar bias
        ],
        out_specs=pl.BlockSpec((tm, 1), lambda i: (i, 0)),
        compiler_params=cparams,
    )(x, w_row, b_smem)
    return out


if __name__ == "__main__":
    key = jax.random.PRNGKey(0)
    kx, kw, kb, kx2, kw2, kb2 = jax.random.split(key, 6)

    # --- Primary demo shape (matches the dataset): small D -> lane-dense path. ---
    batch, input_dim = 16, 8
    x = jax.random.normal(kx, (batch, input_dim), dtype=jnp.float32)
    bound = 1.0 / jnp.sqrt(float(input_dim))
    weight = jax.random.uniform(kw, (1, input_dim), minval=-bound, maxval=bound,
                                dtype=jnp.float32)
    bias = jax.random.uniform(kb, (1,), minval=-bound, maxval=bound,
                              dtype=jnp.float32)

    out = linear_regression_forward(x, weight, bias)
    jax.block_until_ready(out)
    ref = jnp.sum(x * weight, axis=-1, keepdims=True) + bias
    assert out.shape == (batch, 1)
    assert jnp.allclose(out, ref, atol=1e-5, rtol=1e-5)

    # --- Secondary check: row-major path (D >= 128) with two-stage reduce. ---
    b2, d2 = 32, 256
    x2 = jax.random.normal(kx2, (b2, d2), dtype=jnp.float32)
    bound2 = 1.0 / jnp.sqrt(float(d2))
    w2 = jax.random.uniform(kw2, (1, d2), minval=-bound2, maxval=bound2,
                            dtype=jnp.float32)
    bias2 = jax.random.uniform(kb2, (1,), minval=-bound2, maxval=bound2,
                               dtype=jnp.float32)

    out2 = linear_regression_forward(x2, w2, bias2)
    jax.block_until_ready(out2)
    ref2 = jnp.sum(x2 * w2, axis=-1, keepdims=True) + bias2
    assert out2.shape == (b2, 1)
    assert jnp.allclose(out2, ref2, atol=1e-4, rtol=1e-5)

    print("KERNEL_OK")
</pallas_src>

<mosaic_0001>
module attributes {stable_mosaic.version = 11 : i64} {
  func.func @_linear_lanes_kernel(%arg0: i32, %arg1: memref<8x16xf32, #tpu.memory_space<vmem>>, %arg2: memref<8x1xf32, #tpu.memory_space<vmem>>, %arg3: memref<1x1xf32, #tpu.memory_space<smem>>, %arg4: memref<1x16xf32, #tpu.memory_space<vmem>>) attributes {dimension_semantics = [#tpu.dimension_semantics<parallel>], iteration_bounds = array<i64: 1>, scalar_prefetch = 0 : i64, scratch_operands = 0 : i64, tpu.core_type = #tpu.core_type<tc>, window_params = [{transform_indices = @transform_0, window_bounds = array<i64: 8, 16>}, {pipeline_mode = #tpu.pipeline_mode<synchronous>, transform_indices = @transform_1, window_bounds = array<i64: 8, 1>}, {transform_indices = @transform_2, window_bounds = array<i64: 1, 1>}, {transform_indices = @transform_3, window_bounds = array<i64: 1, 16>}]} {
    %c0 = arith.constant 0 : index
    %c0_0 = arith.constant 0 : index
    %0 = vector.load %arg1[%c0, %c0_0] : memref<8x16xf32, #tpu.memory_space<vmem>>, vector<8x16xf32>
    %c0_1 = arith.constant 0 : index
    %c0_2 = arith.constant 0 : index
    %1 = vector.load %arg2[%c0_1, %c0_2] : memref<8x1xf32, #tpu.memory_space<vmem>>, vector<8x1xf32>
    %2 = vector.broadcast %1 : vector<8x1xf32> to vector<8x16xf32>
    %3 = arith.mulf %0, %2 : vector<8x16xf32>
    %cst = arith.constant dense<0.000000e+00> : vector<16xf32>
    %4 = vector.multi_reduction <add>, %3, %cst [0] : vector<8x16xf32> to vector<16xf32>
    %5 = vector.shape_cast %4 : vector<16xf32> to vector<1x16xf32>
    %c0_3 = arith.constant 0 : index
    %c0_4 = arith.constant 0 : index
    %6 = memref.load %arg3[%c0_3, %c0_4] : memref<1x1xf32, #tpu.memory_space<smem>>
    %7 = vector.broadcast %6 : f32 to vector<1x16xf32>
    %8 = arith.addf %5, %7 : vector<1x16xf32>
    %c0_5 = arith.constant 0 : index
    %c0_6 = arith.constant 0 : index
    %9 = vector.load %arg4[%c0_5, %c0_6] : memref<1x16xf32, #tpu.memory_space<vmem>>, vector<1x16xf32>
    tpu.vector_store %arg4[%c0_5, %c0_6], %8 {strides = array<i32>} : memref<1x16xf32, #tpu.memory_space<vmem>>, vector<1x16xf32>,
    return
  }
  func.func @transform_0(%arg0: i32) -> (i32, i32) {
    %c0_i32 = arith.constant 0 : i32
    %c0_i32_0 = arith.constant 0 : i32
    return %c0_i32, %arg0 : i32, i32
  }
  func.func @transform_1(%arg0: i32) -> (i32, i32) {
    %c0_i32 = arith.constant 0 : i32
    %c0_i32_0 = arith.constant 0 : i32
    %c0_i32_1 = arith.constant 0 : i32
    return %c0_i32, %c0_i32_0 : i32, i32
  }
  func.func @transform_2(%arg0: i32) -> (i32, i32) {
    %c0_i32 = arith.constant 0 : i32
    %c0_i32_0 = arith.constant 0 : i32
    %c0_i32_1 = arith.constant 0 : i32
    return %c0_i32, %c0_i32_0 : i32, i32
  }
  func.func @transform_3(%arg0: i32) -> (i32, i32) {
    %c0_i32 = arith.constant 0 : i32
    %c0_i32_0 = arith.constant 0 : i32
    return %c0_i32, %arg0 : i32, i32
  }
}

</mosaic_0001>

<bundles_post_ra>
// kernel: tpu_custom_call.1
= control target key start
LH: loop header
LB: loop body
LE: loop exit
PB: predicated region body
PF: predicated region fallthrough
CT: control target
= control target key end

     0   :  { %s110_s0 = inlined_call_operand.vmem [shape: f32[8,16], index: 0, kind: input, shape index: {}]   ;;  %s111_s1 = inlined_call_operand.vmem [shape: f32[8,1], index: 1, kind: input, shape index: {}]   ;;  %s112_s2 = inlined_call_operand.<no memory space> [shape: f32[1,1], index: 2, kind: input, shape index: {}]   ;;  %s113_s3 = inlined_call_operand.hbm [shape: f32[1,16], index: 3, kind: output, shape index: {}]  }
   0x1   :  { %v17_v0 = vld [vmem:[%s111_s1] sm:$0xff] }
   0x2   :  { %9 = vsyncpa [#allocation4], 0  ;;  %v76_v1 = vmov 0   ;;  %v16_v2 = vld [vmem:[%s110_s0] sm:$0xff]  ;;  %vm24_vm0 = vcmask 130048   ;;  %v33_v11 = vstv %s112_s2  ;;  %s77_s1 = smov [#allocation3]  }
   0x3   :  { %53 = vset.pattern.permute.xlu0 %v76_v1  ;;  %s43_s18 = sshll.u32 %s77_s1, 4  ;;  %vm35_vm1 = vcmask 122880   ;;  %s44_s18 = int_to_ptr.vmem [resolvable:$true] %s43_s18 }
   0x4   :  { %20 = vperm.xlu0 %53, %v17_v0   ;;  %s54_s0 = scalar_lea.vmem %s44_s18, 16  ;;  %s58_s19 = scalar_lea.vmem %s44_s18, 32 }
   0x5   :  { %p55_p0 = scmp.ne.s32.totalorder %s44_s18, %s54_s0  ;;  %p59_p1 = scmp.lt.s32.totalorder %s44_s18, %s44_s18 }
   0x6   :  { %p60_p2 = scmp.lt.s32.totalorder %s58_s19, %s54_s0 }
   0x8   :  { %p61_p3 = por %p60_p2, %p59_p1 }
   0xa   :  { %p62_p4 = pnand %p61_p3, %p55_p0 }
  0x7f   :  { %v21_v3 = vpop.permute.xlu0 %20 }
  0x80   :  { %v23_v4 = vmul.f32 %v21_v3, %v16_v2 }
  0x82   :  { %v25_v5 = vsel %vm24_vm0, %v23_v4, 0.0 }
  0x83   :  { %v26_v6 = vrot.slane %v25_v5, 4 }
  0x85   :  { %v27_v7 = vadd.f32 %v26_v6, %v25_v5 }
  0x87   :  { %v28_v8 = vrot.slane %v27_v7, 2 }
  0x89   :  { %v29_v9 = vadd.f32 %v28_v8, %v27_v7 }
  0x8b   :  { %v30_v10 = vrot.slane %v29_v9, 1 }
  0x8d   :  { %v31_v12 = vadd.f32 %v30_v10, %v29_v9 }
  0x8f   :  { %v34_v13 = vadd.f32 %v33_v11, %v31_v12 }
  0x91   :  { %36 = vst.msk [vmem:[#allocation3] sm:$0x1] %vm35_vm1, %v34_v13 }
  0x92   :  { %65 = shalt.err (!%p62_p4)
}
  0x93   :  { %46 = dma.vmem_to_hbm [thread:$0]  %s44_s18, 16, %s113_s3, [#allocation4]  }
  0x94   :  { %74 = dma.done.wait [#allocation4], 16  }
  0x95   :  { %75 = vsyncadd [#allocation4], 4294967280 }
  0x96   :  { %50 = vsyncpa [#allocation4], 1 }

</bundles_post_ra>
